<compile_context>
chip_gen: v6e
topology: v6e:2x2x1
jax: 0.10.0
libtpu: 0.0.40
codegen_flags: <defaults>
</compile_context>

<pallas_src>
import functools

import jax
import jax.numpy as jnp
from jax.experimental import pallas as pl
from jax.experimental.pallas import tpu as pltpu

IN_PAD = 8     # 4 features + 1 ones-lane, padded to 8 (sublane-friendly, last dim == full dim)
H_PAD = 128    # hidden dims 50 / 20 padded to one full lane width
OUT_PAD = 8    # 3 classes padded to 8
NEG_MASK = -1e30  # finite "minus infinity" baked into padded logit lanes


def _round_up(n, m):
    return (n + m - 1) // m * m


def _choose_tile_m(B):
    """Sublane-aligned batch tile; keep >= 2 grid steps for v7x megacore when batch allows."""
    Bp8 = _round_up(B, 8)
    if Bp8 <= 16:
        return Bp8                                   # tiny batch: single block
    half = _round_up(-(-Bp8 // 2), 8)                # ceil(Bp8/2) rounded to 8
    return min(512, half)                            # cap tile at 512 rows (~85% of HBM roofline)


# ----------------------------------------------------------------------------
# Pallas kernel: fused fc1+relu -> fc2+relu -> fc3 -> softmax
# (biases folded into the weights via the ones-lane; mask baked into w3)
# ----------------------------------------------------------------------------
def _iris_mlp_kernel(x_ref, w1_ref, w2_ref, w3_ref, o_ref):
    h = jnp.dot(x_ref[...], w1_ref[...], preferred_element_type=jnp.float32)
    h = jnp.maximum(h, 0.0)
    h = jnp.dot(h, w2_ref[...], preferred_element_type=jnp.float32)
    h = jnp.maximum(h, 0.0)
    logits = jnp.dot(h, w3_ref[...], preferred_element_type=jnp.float32)

    # Softmax over 8 lanes: padded lanes carry -1e30 (from w3) -> exp underflows to 0.
    m = jnp.max(logits, axis=1, keepdims=True)
    e = jnp.exp(logits - m)
    inv = 1.0 / jnp.sum(e, axis=1, keepdims=True)    # one reciprocal per row, then multiply
    o_ref[...] = (e * inv).astype(o_ref.dtype)


# ----------------------------------------------------------------------------
# Parameter handling
# ----------------------------------------------------------------------------
def init_params(key, input_features=4, hidden1=50, hidden2=20, output_features=3):
    """PyTorch-default-like uniform init. Weights stored as [out, in] (torch layout)."""
    def uniform(k, shape, fan_in):
        bound = 1.0 / jnp.sqrt(fan_in)
        return jax.random.uniform(k, shape, jnp.float32, -bound, bound)

    ks = jax.random.split(key, 6)
    return {
        "fc1_w": uniform(ks[0], (hidden1, input_features), input_features),
        "fc1_b": uniform(ks[1], (hidden1,), input_features),
        "fc2_w": uniform(ks[2], (hidden2, hidden1), hidden1),
        "fc2_b": uniform(ks[3], (hidden2,), hidden1),
        "fc3_w": uniform(ks[4], (output_features, hidden2), hidden2),
        "fc3_b": uniform(ks[5], (output_features,), hidden2),
    }


def prepare_params(params, n_in=4, h1=50, h2=20, n_out=3):
    """Transpose to [in, out], zero-pad, fold biases via the ones-lane, bake softmax mask.

    Done once, OUTSIDE the jitted forward.
    """
    assert n_in + 1 <= IN_PAD and h1 + 1 <= H_PAD and h2 + 1 <= H_PAD and n_out <= OUT_PAD

    w1 = jnp.zeros((IN_PAD, H_PAD), jnp.float32)
    w1 = w1.at[:n_in, :h1].set(jnp.asarray(params["fc1_w"], jnp.float32).T)
    w1 = w1.at[n_in, :h1].set(jnp.asarray(params["fc1_b"], jnp.float32))  # bias via ones-lane
    w1 = w1.at[n_in, h1].set(1.0)       # pass-through: h1[:, h1] == 1 for real rows (relu keeps it)

    w2 = jnp.zeros((H_PAD, H_PAD), jnp.float32)
    w2 = w2.at[:h1, :h2].set(jnp.asarray(params["fc2_w"], jnp.float32).T)
    w2 = w2.at[h1, :h2].set(jnp.asarray(params["fc2_b"], jnp.float32))
    w2 = w2.at[h1, h2].set(1.0)         # pass-through for fc3's bias

    w3 = jnp.zeros((H_PAD, OUT_PAD), jnp.float32)
    w3 = w3.at[:h2, :n_out].set(jnp.asarray(params["fc3_w"], jnp.float32).T)
    w3 = w3.at[h2, :n_out].set(jnp.asarray(params["fc3_b"], jnp.float32))
    w3 = w3.at[h2, n_out:].set(NEG_MASK)  # padded logit lanes -> exp() == 0 in softmax

    return {"w1": w1, "w2": w2, "w3": w3}


# ----------------------------------------------------------------------------
# Forward pass
# ----------------------------------------------------------------------------
def iris_forward(x, pp, n_in=4, n_out=3):
    """x: [B, n_in] float -> softmax probabilities [B, n_out]."""
    B = x.shape[0]
    tile_m = _choose_tile_m(B)
    Bp = _round_up(B, tile_m)

    # Narrow lane-dense-enough input slab: [Bp, 8] = features, ones-lane, zeros.
    xp = jnp.zeros((Bp, IN_PAD), jnp.float32)
    xp = xp.at[:B, :n_in].set(x.astype(jnp.float32))
    xp = xp.at[:B, n_in].set(1.0)        # ones lane folds fc1's bias into w1

    out_padded = pl.pallas_call(
        _iris_mlp_kernel,
        out_shape=jax.ShapeDtypeStruct((Bp, OUT_PAD), jnp.float32),
        grid=(Bp // tile_m,),
        in_specs=[
            pl.BlockSpec((tile_m, IN_PAD), lambda i: (i, 0)),   # x block
            pl.BlockSpec((IN_PAD, H_PAD), lambda i: (0, 0)),    # w1 (bias folded)
            pl.BlockSpec((H_PAD, H_PAD), lambda i: (0, 0)),     # w2 (bias folded)
            pl.BlockSpec((H_PAD, OUT_PAD), lambda i: (0, 0)),   # w3 (bias + mask folded)
        ],
        out_specs=pl.BlockSpec((tile_m, OUT_PAD), lambda i: (i, 0)),
        compiler_params=pltpu.CompilerParams(
            dimension_semantics=("parallel",),   # batch axis: shards across TCs on v7x
        ),
    )(xp, pp["w1"], pp["w2"], pp["w3"])

    return out_padded[:B, :n_out]


# Pure-JAX reference (mirrors the PyTorch module exactly) for verification.
def iris_ref(x, params):
    h = jax.nn.relu(x @ params["fc1_w"].T + params["fc1_b"])
    h = jax.nn.relu(h @ params["fc2_w"].T + params["fc2_b"])
    logits = h @ params["fc3_w"].T + params["fc3_b"]
    return jax.nn.softmax(logits, axis=1)


if __name__ == "__main__":
    key = jax.random.PRNGKey(0)
    k_x, k_x2, k_p = jax.random.split(key, 3)

    F, C = 4, 3                                    # iris: 4 features, 3 classes
    params = init_params(k_p)
    pp = prepare_params(params)                    # pad / transpose / fold once, outside jit

    fwd = jax.jit(functools.partial(iris_forward, n_in=F, n_out=C))

    # Small-batch check (grid = 1).
    x = jax.random.normal(k_x, (2, F), jnp.float32)
    out = jax.block_until_ready(fwd(x, pp))
    ref = iris_ref(x, params)
    assert out.shape == (2, C)
    assert jnp.allclose(jnp.sum(out, axis=1), 1.0, atol=1e-5)
    assert jnp.allclose(out, ref, atol=1e-5, rtol=1e-5)

    # Iris-sized batch check (grid = 2: exercises the parallel batch axis + padded rows).
    x2 = jax.random.normal(k_x2, (150, F), jnp.float32)
    out2 = jax.block_until_ready(fwd(x2, pp))
    ref2 = iris_ref(x2, params)
    assert out2.shape == (150, C)
    assert jnp.allclose(jnp.sum(out2, axis=1), 1.0, atol=1e-5)
    assert jnp.allclose(out2, ref2, atol=1e-5, rtol=1e-5)

    print("KERNEL_OK")
</pallas_src>

<mosaic_0001>
module attributes {stable_mosaic.version = 11 : i64} {
  func.func @_iris_mlp_kernel(%arg0: i32, %arg1: memref<8x8xf32, #tpu.memory_space<vmem>>, %arg2: memref<8x128xf32, #tpu.memory_space<vmem>>, %arg3: memref<128x128xf32, #tpu.memory_space<vmem>>, %arg4: memref<128x8xf32, #tpu.memory_space<vmem>>, %arg5: memref<8x8xf32, #tpu.memory_space<vmem>>) attributes {dimension_semantics = [#tpu.dimension_semantics<parallel>], iteration_bounds = array<i64: 1>, scalar_prefetch = 0 : i64, scratch_operands = 0 : i64, tpu.core_type = #tpu.core_type<tc>, window_params = [{transform_indices = @transform_0, window_bounds = array<i64: 8, 8>}, {pipeline_mode = #tpu.pipeline_mode<synchronous>, transform_indices = @transform_1, window_bounds = array<i64: 8, 128>}, {pipeline_mode = #tpu.pipeline_mode<synchronous>, transform_indices = @transform_2, window_bounds = array<i64: 128, 128>}, {pipeline_mode = #tpu.pipeline_mode<synchronous>, transform_indices = @transform_3, window_bounds = array<i64: 128, 8>}, {transform_indices = @transform_4, window_bounds = array<i64: 8, 8>}]} {
    %c0 = arith.constant 0 : index
    %c0_0 = arith.constant 0 : index
    %0 = vector.load %arg1[%c0, %c0_0] : memref<8x8xf32, #tpu.memory_space<vmem>>, vector<8x8xf32>
    %c0_1 = arith.constant 0 : index
    %c0_2 = arith.constant 0 : index
    %1 = vector.load %arg2[%c0_1, %c0_2] : memref<8x128xf32, #tpu.memory_space<vmem>>, vector<8x128xf32>
    %cst = arith.constant dense<0.000000e+00> : vector<8x128xf32>
    %2 = tpu.matmul %0, %1, %cst {dimension_numbers = #tpu.dot_dimension_numbers<[1], [0], [0], [1], [0, 0, 1, 1], [], []>} : vector<8x8xf32>, vector<8x128xf32>, vector<8x128xf32> -> vector<8x128xf32>
    %cst_3 = arith.constant 0.000000e+00 : f32
    %3 = vector.broadcast %cst_3 : f32 to vector<8x128xf32>
    %4 = arith.maximumf %2, %3 : vector<8x128xf32>
    %c0_4 = arith.constant 0 : index
    %c0_5 = arith.constant 0 : index
    %5 = vector.load %arg3[%c0_4, %c0_5] : memref<128x128xf32, #tpu.memory_space<vmem>>, vector<128x128xf32>
    %cst_6 = arith.constant dense<0.000000e+00> : vector<8x128xf32>
    %6 = tpu.matmul %4, %5, %cst_6 {dimension_numbers = #tpu.dot_dimension_numbers<[1], [0], [0], [1], [0, 0, 1, 1], [], []>} : vector<8x128xf32>, vector<128x128xf32>, vector<8x128xf32> -> vector<8x128xf32>
    %cst_7 = arith.constant 0.000000e+00 : f32
    %7 = vector.broadcast %cst_7 : f32 to vector<8x128xf32>
    %8 = arith.maximumf %6, %7 : vector<8x128xf32>
    %c0_8 = arith.constant 0 : index
    %c0_9 = arith.constant 0 : index
    %9 = vector.load %arg4[%c0_8, %c0_9] : memref<128x8xf32, #tpu.memory_space<vmem>>, vector<128x8xf32>
    %cst_10 = arith.constant dense<0.000000e+00> : vector<8x8xf32>
    %10 = tpu.matmul %8, %9, %cst_10 {dimension_numbers = #tpu.dot_dimension_numbers<[1], [0], [0], [1], [0, 0, 1, 1], [], []>} : vector<8x128xf32>, vector<128x8xf32>, vector<8x8xf32> -> vector<8x8xf32>
    %cst_11 = arith.constant dense<0xFF800000> : vector<8xf32>
    %11 = vector.multi_reduction <maximumf>, %10, %cst_11 [1] : vector<8x8xf32> to vector<8xf32>
    %12 = vector.shape_cast %11 : vector<8xf32> to vector<8x1xf32>
    %13 = vector.broadcast %12 : vector<8x1xf32> to vector<8x8xf32>
    %14 = arith.subf %10, %13 : vector<8x8xf32>
    %15 = math.exp %14 : vector<8x8xf32>
    %cst_12 = arith.constant dense<0.000000e+00> : vector<8xf32>
    %16 = vector.multi_reduction <add>, %15, %cst_12 [1] : vector<8x8xf32> to vector<8xf32>
    %17 = vector.shape_cast %16 : vector<8xf32> to vector<8x1xf32>
    %cst_13 = arith.constant 1.000000e+00 : f32
    %18 = vector.broadcast %cst_13 : f32 to vector<8x1xf32>
    %19 = arith.divf %18, %17 : vector<8x1xf32>
    %20 = vector.broadcast %19 : vector<8x1xf32> to vector<8x8xf32>
    %21 = arith.mulf %15, %20 : vector<8x8xf32>
    %c0_14 = arith.constant 0 : index
    %c0_15 = arith.constant 0 : index
    %22 = vector.load %arg5[%c0_14, %c0_15] : memref<8x8xf32, #tpu.memory_space<vmem>>, vector<8x8xf32>
    tpu.vector_store %arg5[%c0_14, %c0_15], %21 {strides = array<i32>} : memref<8x8xf32, #tpu.memory_space<vmem>>, vector<8x8xf32>,
    return
  }
  func.func @transform_0(%arg0: i32) -> (i32, i32) {
    %c0_i32 = arith.constant 0 : i32
    %c0_i32_0 = arith.constant 0 : i32
    return %arg0, %c0_i32 : i32, i32
  }
  func.func @transform_1(%arg0: i32) -> (i32, i32) {
    %c0_i32 = arith.constant 0 : i32
    %c0_i32_0 = arith.constant 0 : i32
    %c0_i32_1 = arith.constant 0 : i32
    return %c0_i32, %c0_i32_0 : i32, i32
  }
  func.func @transform_2(%arg0: i32) -> (i32, i32) {
    %c0_i32 = arith.constant 0 : i32
    %c0_i32_0 = arith.constant 0 : i32
    %c0_i32_1 = arith.constant 0 : i32
    return %c0_i32, %c0_i32_0 : i32, i32
  }
  func.func @transform_3(%arg0: i32) -> (i32, i32) {
    %c0_i32 = arith.constant 0 : i32
    %c0_i32_0 = arith.constant 0 : i32
    %c0_i32_1 = arith.constant 0 : i32
    return %c0_i32, %c0_i32_0 : i32, i32
  }
  func.func @transform_4(%arg0: i32) -> (i32, i32) {
    %c0_i32 = arith.constant 0 : i32
    %c0_i32_0 = arith.constant 0 : i32
    return %arg0, %c0_i32 : i32, i32
  }
}

</mosaic_0001>

<bundles_post_ra>
// kernel: iris_forward.1
= control target key start
LH: loop header
LB: loop body
LE: loop exit
PB: predicated region body
PF: predicated region fallthrough
CT: control target
= control target key end

     0   :  { %vm19_vm0 = vcmask 64512   ;;  %v402_v0 = vmov 0.0   ;;  %vm403_vm1 = vmmov 0   ;;  %s577_s1 = inlined_call_operand.vmem [shape: f32[8,128], index: 1, kind: input, shape index: {}]   ;;  %s578_s0 = inlined_call_operand.vmem [shape: f32[8,8], index: 0, kind: input, shape index: {}]   ;;  %s579_s2 = inlined_call_operand.vmem [shape: f32[128,128], index: 2, kind: input, shape index: {}]   ;;  %s580_s3 = inlined_call_operand.vmem [shape: f32[128,8], index: 3, kind: input, shape index: {}]   ;;  %s581_s4 = inlined_call_operand.vmem [shape: f32[8,8], index: 4, kind: output, shape index: {}]  }
   0x1   :  { %321 = vmatprep.subr.mxu0 %v402_v0  ;;  %v18_v1 = vld [vmem:[%s577_s1] sm:$0xff]  ;;  %323 = vmatprep.mubr.msk.f32.mxu0 %vm403_vm1, %v402_v0  ;;  %v109_v3 = vld [vmem:[%s579_s2 + $0x78] sm:$0xff]  ;;  %v108_v4 = vld [vmem:[%s579_s2 + $0x70] sm:$0xff] }
   0x2   :  { %v17_v2 = vld [vmem:[%s578_s0] sm:$0xff]  ;;  %322 = vmatpush3.msra.mxu0 %v18_v1  ;;  %326 = vmatprep.subr.mxu1 %v402_v0  ;;  %v107_v5 = vld [vmem:[%s579_s2 + $0x68] sm:$0xff]  ;;  %v105_v7 = vld [vmem:[%s579_s2 + $0x58] sm:$0xff] }
   0x3   :  { %324 = vmatmul.mubr.msk.f32.vlgmr.msra.gmra.mxu0 %vm19_vm0, %v17_v2  ;;  %327 = vmatpush3.msra.mxu1 %v109_v3  ;;  %v106_v6 = vld [vmem:[%s579_s2 + $0x60] sm:$0xff]  ;;  %v104_v8 = vld [vmem:[%s579_s2 + $0x50] sm:$0xff]  ;;  %v103_v9 = vld [vmem:[%s579_s2 + $0x48] sm:$0xff] }
   0x4   :  { %328 = vmatprep.subr.mxu1 %v402_v0  ;;  %358 = vmatprep.mubr.msk.f32.mxu1 %vm403_vm1, %v402_v0  ;;  %v102_v10 = vld [vmem:[%s579_s2 + $0x40] sm:$0xff]  ;;  %v101_v11 = vld [vmem:[%s579_s2 + $0x38] sm:$0xff]  ;;  %v100_v12 = vld [vmem:[%s579_s2 + $0x30] sm:$0xff] }
   0x5   :  { %329 = vmatpush3.msra.mxu1 %v108_v4  ;;  %361 = vmatprep.subr.mxu0 %v402_v0  ;;  %v99_v13 = vld [vmem:[%s579_s2 + $0x28] sm:$0xff]  ;;  %v98_v14 = vld [vmem:[%s579_s2 + $0x20] sm:$0xff]  ;;  %v97_v15 = vld [vmem:[%s579_s2 + $0x18] sm:$0xff] }
   0x6   :  { %330 = vmatprep.subr.mxu1 %v402_v0  ;;  %393 = vmatprep.mubr.msk.f32.mxu0 %vm403_vm1, %v402_v0  ;;  %v96_v16 = vld [vmem:[%s579_s2 + $0x10] sm:$0xff]  ;;  %v95_v17 = vld [vmem:[%s579_s2 + $0x8] sm:$0xff]  ;;  %v94_v18 = vld [vmem:[%s579_s2] sm:$0xff] }
   0x7   :  { %331 = vmatpush3.msra.mxu1 %v107_v5  ;;  %v196_v19 = vld [vmem:[%s580_s3 + $0x78] sm:$0xff]  ;;  %v195_v20 = vld [vmem:[%s580_s3 + $0x70] sm:$0xff]  ;;  %v194_v21 = vld [vmem:[%s580_s3 + $0x68] sm:$0xff] }
   0x8   :  { %332 = vmatprep.subr.mxu1 %v402_v0  ;;  %362 = vmatpush3.msra.mxu0 %v196_v19  ;;  %v193_v22 = vld [vmem:[%s580_s3 + $0x60] sm:$0xff]  ;;  %v192_v23 = vld [vmem:[%s580_s3 + $0x58] sm:$0xff]  ;;  %v191_v24 = vld [vmem:[%s580_s3 + $0x50] sm:$0xff] }
   0x9   :  { %333 = vmatpush3.msra.mxu1 %v106_v6  ;;  %363 = vmatprep.subr.mxu0 %v402_v0  ;;  %v190_v25 = vld [vmem:[%s580_s3 + $0x48] sm:$0xff]  ;;  %v189_v26 = vld [vmem:[%s580_s3 + $0x40] sm:$0xff]  ;;  %v188_v27 = vld [vmem:[%s580_s3 + $0x38] sm:$0xff] }
   0xa   :  { %334 = vmatprep.subr.mxu1 %v402_v0  ;;  %364 = vmatpush3.msra.mxu0 %v195_v20  ;;  %v187_v28 = vld [vmem:[%s580_s3 + $0x30] sm:$0xff]  ;;  %v186_v29 = vld [vmem:[%s580_s3 + $0x28] sm:$0xff]  ;;  %v185_v30 = vld [vmem:[%s580_s3 + $0x20] sm:$0xff] }
   0xb   :  { %335 = vmatpush3.msra.mxu1 %v105_v7  ;;  %365 = vmatprep.subr.mxu0 %v402_v0  ;;  %v184_v31 = vld [vmem:[%s580_s3 + $0x18] sm:$0xff]  ;;  %v183_v32 = vld [vmem:[%s580_s3 + $0x10] sm:$0xff]  ;;  %v182_v36 = vld [vmem:[%s580_s3 + $0x8] sm:$0xff] }
   0xc   :  { %336 = vmatprep.subr.mxu1 %v402_v0  ;;  %366 = vmatpush3.msra.mxu0 %v194_v21  ;;  %v181_v37 = vld [vmem:[%s580_s3] sm:$0xff] }
   0xd   :  { %337 = vmatpush3.msra.mxu1 %v104_v8  ;;  %367 = vmatprep.subr.mxu0 %v402_v0 }
   0xe   :  { %338 = vmatprep.subr.mxu1 %v402_v0  ;;  %368 = vmatpush3.msra.mxu0 %v193_v22 }
   0xf   :  { %339 = vmatpush3.msra.mxu1 %v103_v9  ;;  %369 = vmatprep.subr.mxu0 %v402_v0 }
  0x10   :  { %340 = vmatprep.subr.mxu1 %v402_v0  ;;  %370 = vmatpush3.msra.mxu0 %v192_v23 }
  0x11   :  { %341 = vmatpush3.msra.mxu1 %v102_v10  ;;  %371 = vmatprep.subr.mxu0 %v402_v0 }
  0x12   :  { %342 = vmatprep.subr.mxu1 %v402_v0  ;;  %372 = vmatpush3.msra.mxu0 %v191_v24 }
  0x13   :  { %343 = vmatpush3.msra.mxu1 %v101_v11  ;;  %373 = vmatprep.subr.mxu0 %v402_v0 }
  0x14   :  { %344 = vmatprep.subr.mxu1 %v402_v0  ;;  %374 = vmatpush3.msra.mxu0 %v190_v25 }
  0x15   :  { %345 = vmatpush3.msra.mxu1 %v100_v12  ;;  %375 = vmatprep.subr.mxu0 %v402_v0 }
  0x16   :  { %346 = vmatprep.subr.mxu1 %v402_v0  ;;  %376 = vmatpush3.msra.mxu0 %v189_v26 }
  0x17   :  { %347 = vmatpush3.msra.mxu1 %v99_v13  ;;  %377 = vmatprep.subr.mxu0 %v402_v0 }
  0x18   :  { %348 = vmatprep.subr.mxu1 %v402_v0  ;;  %378 = vmatpush3.msra.mxu0 %v188_v27 }
  0x19   :  { %349 = vmatpush3.msra.mxu1 %v98_v14  ;;  %379 = vmatprep.subr.mxu0 %v402_v0 }
  0x1a   :  { %350 = vmatprep.subr.mxu1 %v402_v0  ;;  %380 = vmatpush3.msra.mxu0 %v187_v28 }
  0x1b   :  { %351 = vmatpush3.msra.mxu1 %v97_v15  ;;  %381 = vmatprep.subr.mxu0 %v402_v0 }
  0x1c   :  { %352 = vmatprep.subr.mxu1 %v402_v0  ;;  %382 = vmatpush3.msra.mxu0 %v186_v29 }
  0x1d   :  { %353 = vmatpush3.msra.mxu1 %v96_v16  ;;  %383 = vmatprep.subr.mxu0 %v402_v0 }
  0x1e   :  { %354 = vmatprep.subr.mxu1 %v402_v0  ;;  %384 = vmatpush3.msra.mxu0 %v185_v30 }
  0x1f   :  { %355 = vmatpush3.msra.mxu1 %v95_v17  ;;  %385 = vmatprep.subr.mxu0 %v402_v0 }
  0x20   :  { %356 = vmatprep.subr.mxu1 %v402_v0  ;;  %386 = vmatpush3.msra.mxu0 %v184_v31 }
  0x21   :  { %357 = vmatpush3.msra.mxu1 %v94_v18  ;;  %387 = vmatprep.subr.mxu0 %v402_v0 }
  0x22   :  { %388 = vmatpush3.msra.mxu0 %v183_v32 }
  0x23   :  { %389 = vmatprep.subr.mxu0 %v402_v0 }
  0x24   :  { %390 = vmatpush3.msra.mxu0 %v182_v36 }
  0x25   :  { %391 = vmatprep.subr.mxu0 %v402_v0 }
  0x26   :  { %392 = vmatpush3.msra.mxu0 %v181_v37 }
  0xc3   :  { %v89_v33 = vpop.f32.mrf.mxu0 }
  0xc4   :  { %v93_v34 = vmax.f32 %v89_v33, 0.0 }
  0xc5   :  { %v325_v35 = vpop.f32.mrf.mxu0 }
  0xc6   :  { %359 = vmatmul.mubr.f32.vlgmr.msra.gmra.mxu1 %v93_v34 }
 0x186   :  { %v176_v38 = vpop.f32.mrf.mxu1 }
 0x187   :  { %v180_v39 = vmax.f32 %v176_v38, 0.0 }
 0x188   :  { %v360_v40 = vpop.f32.mrf.mxu1 }
 0x189   :  { %394 = vmatmul.mubr.f32.vlgmr.msra.gmra.mxu0 %v180_v39 }
 0x249   :  { %v263_v41 = vpop.f32.mrf.mxu0 }
 0x24a   :  { %v267_v42 = vsel %vm19_vm0, %v263_v41, -inf }
 0x24b   :  { %268 = vmax.xlane.f32.xlu0 %v267_v42  ;;  %v395_v43 = vpop.f32.mrf.mxu0 }
 0x2d4   :  { %v269_v44 = vpop.xlane.xlu0 %268 }
 0x2d5   :  { %v270_v45 = vsub.f32 %v263_v41, %v269_v44 }
 0x2d7   :  { %v271_v46 = vmul.f32 1.442695, %v270_v45 }
 0x2d9   :  { %398 = vpow2.f32 %v271_v46 }
 0x2e6   :  { %v399_v47 = vpop.eup %398 }
 0x2e7   :  { %v273_v48 = vsel %vm19_vm0, %v399_v47, 0.0 }
 0x2e8   :  { %274 = vadd.xlane.f32.xlu0 %v273_v48 }
 0x371   :  { %v275_v49 = vpop.xlane.xlu0 %274 }
 0x372   :  { %400 = vrcp.f32 %v275_v49 }
 0x37f   :  { %v401_v50 = vpop.eup %400 }
 0x380   :  { %v278_v51 = vmul.f32 %v401_v50, %v399_v47 }
 0x382   :  { %279 = vst.msk [vmem:[%s581_s4] sm:$0xff] %vm19_vm0, %v278_v51 }

</bundles_post_ra>
